<compile_context>
chip_gen: v7x
topology: tpu7x:2x2x1
jax: 0.10.0
libtpu: 0.0.40
codegen_flags: <defaults>
</compile_context>

<pallas_src>
import functools

import jax
import jax.numpy as jnp
from jax.experimental import pallas as pl
from jax.experimental.pallas import tpu as pltpu

_SUBLANE = 8
_LANE = 128


def _round_up(x: int, m: int) -> int:
    return ((x + m - 1) // m) * m


def _vmem_plan():
    """(pipeline-buffer budget, vmem_limit_bytes) tuned per TPU generation."""
    try:
        cap = int(pltpu.get_tpu_info().vmem_capacity_bytes)
    except Exception:
        cap = 64 * 1024 * 1024  # assume the most constrained generation (v7x)
    # ~40% of physical VMEM for the double-buffered in/out pipeline blocks,
    # leaving headroom for per-band kernel temporaries and compiler scratch.
    budget = min(cap * 2 // 5, 48 * 1024 * 1024)
    limit = min(cap * 3 // 4, budget + 16 * 1024 * 1024)
    return budget, int(limit)


def _pos_enc_kernel(x_ref, o_ref, *, L: int, use_recurrence: bool, refresh: int):
    """x_ref: (tile_r, 128).  o_ref: (1+2L, tile_r, 128); o_ref[b] is band b."""
    xin = x_ref[...]
    x = xin.astype(jnp.float32)
    o_ref[0] = xin.astype(o_ref.dtype)               # identity band, full-lane store
    s = c = None
    for i in range(L):
        if (not use_recurrence) or (i % refresh == 0):
            # exact anchor band: 2 transcendentals (EUP)
            arg = (2.0 ** i) * jnp.pi * x
            s = jnp.sin(arg)
            c = jnp.cos(arg)
        else:
            # double-angle step: 3 mul + 1 sub on the VPU, no transcendentals
            s, c = 2.0 * s * c, c * c - s * s
        o_ref[1 + 2 * i] = s.astype(o_ref.dtype)      # full 128-lane unmasked stores
        o_ref[2 + 2 * i] = c.astype(o_ref.dtype)


def positional_encoding(
    vectors: jax.Array,
    L: int,
    *,
    tile_rows: int | None = None,
    use_recurrence: bool = True,
    refresh: int = 4,
    out_dtype=None,
) -> jax.Array:
    """Pallas equivalent of PositionalEncoding(L).forward(vectors)."""
    N, D = vectors.shape
    B = 1 + 2 * L
    out_dim = D * B
    out_dtype = vectors.dtype if out_dtype is None else out_dtype
    refresh = max(1, int(refresh))

    in_item = jnp.dtype(vectors.dtype).itemsize
    out_item = jnp.dtype(out_dtype).itemsize

    # ---- lane-dense flat layout: (N*D,) -> (R, 128) ---------------------------
    total = N * D
    R = pl.cdiv(max(total, 1), _LANE)
    R8 = _round_up(R, _SUBLANE)

    # ---- row-tile selection ----------------------------------------------------
    budget, vmem_limit = _vmem_plan()
    # Per flat row, the double-buffered pipeline holds one 128-lane input row
    # and B 128-lane output rows.
    bytes_per_row = _LANE * in_item + B * _LANE * out_item
    max_tile = max(_SUBLANE, (budget // (2 * bytes_per_row)) // _SUBLANE * _SUBLANE)

    if tile_rows is None:
        tile_r = min(max_tile, R8)
    else:
        tile_r = min(max_tile, _round_up(max(_SUBLANE, min(tile_rows, R8)), _SUBLANE))
    tile_r = max(_SUBLANE, tile_r)

    grid_r = pl.cdiv(R8, tile_r)
    if grid_r == 1 and R8 > _SUBLANE:
        # Give the "parallel" row axis >= 2 steps so v7x's 2 TensorCores share it.
        tile_r = _round_up(pl.cdiv(R8, 2), _SUBLANE)
        grid_r = pl.cdiv(R8, tile_r)
    elif 1 < grid_r <= 8 and grid_r % 2 == 1:
        # Prefer an even step count so the two v7x TensorCores stay balanced.
        for t in range(tile_r - _SUBLANE, _SUBLANE - 1, -_SUBLANE):
            g = pl.cdiv(R8, t)
            if g > grid_r + 3:
                break
            if g % 2 == 0:
                tile_r, grid_r = t, g
                break

    R_pad = grid_r * tile_r

    # ---- pad + reshape input ---------------------------------------------------
    flat = vectors.reshape(total)
    pad = R_pad * _LANE - total
    if pad:
        flat = jnp.pad(flat, (0, pad))
    x2d = flat.reshape(R_pad, _LANE)

    # ---- cost estimate (advisory) ----------------------------------------------
    elems = R_pad * _LANE
    n_anchor = -(-L // refresh) if use_recurrence else L
    cost = pl.CostEstimate(
        flops=int(elems) * (1 + 5 * L),
        transcendentals=int(elems) * 2 * n_anchor,
        bytes_accessed=int(elems) * (in_item + B * out_item),
    )

    kernel = functools.partial(
        _pos_enc_kernel, L=L, use_recurrence=use_recurrence, refresh=refresh
    )

    out3 = pl.pallas_call(
        kernel,
        out_shape=jax.ShapeDtypeStruct((B, R_pad, _LANE), out_dtype),
        grid=(grid_r,),
        in_specs=[pl.BlockSpec((tile_r, _LANE), lambda i: (i, 0))],
        out_specs=pl.BlockSpec((B, tile_r, _LANE), lambda i: (0, i, 0)),
        compiler_params=pltpu.CompilerParams(
            dimension_semantics=("parallel",),
            vmem_limit_bytes=vmem_limit,
        ),
        cost_estimate=cost,
    )(x2d)

    # ---- undo the lane-dense layout: (B, R_pad, 128) -> (N, B*D) ----------------
    out = out3.reshape(B, R_pad * _LANE)[:, :total]       # drop padding
    out = out.reshape(B, N, D).transpose(1, 0, 2).reshape(N, out_dim)
    return out


def positional_encoding_ref(vectors: jax.Array, L: int) -> jax.Array:
    """Pure-JAX reference mirroring the PyTorch forward."""
    elements = [vectors]
    for i in range(L):
        elements += [jnp.sin(2.0 ** i * jnp.pi * vectors),
                     jnp.cos(2.0 ** i * jnp.pi * vectors)]
    return jnp.concatenate(elements, axis=1)


if __name__ == "__main__":
    L = 4          # frequency bands
    N, D = 16, 3   # small point batch, 3-D coordinates (output_dim() == 3 + L*2*3)

    key = jax.random.PRNGKey(0)
    k0, k1 = jax.random.split(key)
    vectors = jax.random.uniform(k0, (N, D), dtype=jnp.float32, minval=-1.0, maxval=1.0)

    # default path (recurrence with periodic exact re-anchoring)
    out = jax.block_until_ready(positional_encoding(vectors, L))
    ref = positional_encoding_ref(vectors, L)
    assert out.shape == (N, D * (1 + 2 * L)), out.shape
    assert jnp.allclose(out, ref, atol=2e-5, rtol=2e-5), "mismatch vs reference (default)"

    # exact sin/cos path + non-128-aligned / padded flat layout (N*D = 57)
    v2 = jax.random.uniform(k1, (19, D), dtype=jnp.float32, minval=-1.0, maxval=1.0)
    out2 = jax.block_until_ready(positional_encoding(v2, L, use_recurrence=False))
    assert out2.shape == (19, D * (1 + 2 * L)), out2.shape
    assert jnp.allclose(out2, positional_encoding_ref(v2, L), atol=1e-5, rtol=1e-5), \
        "mismatch vs reference (exact path)"

    # NeRF-typical L=10: exact path stays tight ...
    out3 = jax.block_until_ready(positional_encoding(vectors, 10, use_recurrence=False))
    assert jnp.allclose(out3, positional_encoding_ref(vectors, 10), atol=1e-5, rtol=1e-5), \
        "mismatch vs reference (exact, L=10)"
    # ... and the re-anchored recurrence stays within ~1 ulp of the (large)
    # band arguments, i.e. the same order as the reference's own argument
    # rounding at 2^9·π·x ≈ 1.6e3 rad.
    out4 = jax.block_until_ready(positional_encoding(vectors, 10))
    assert jnp.allclose(out4, positional_encoding_ref(vectors, 10), atol=5e-4, rtol=1e-5), \
        "mismatch vs reference (recurrence, L=10)"

    print("KERNEL_OK")
</pallas_src>

<mosaic_0001>
module attributes {stable_mosaic.version = 11 : i64} {
  func.func @_pos_enc_kernel(%arg0: i32, %arg1: memref<8x128xf32, #tpu.memory_space<vmem>>, %arg2: memref<9x8x128xf32, #tpu.memory_space<vmem>>) attributes {dimension_semantics = [#tpu.dimension_semantics<parallel>], iteration_bounds = array<i64: 1>, scalar_prefetch = 0 : i64, scratch_operands = 0 : i64, tpu.core_type = #tpu.core_type<tc>, window_params = [{transform_indices = @transform_0, window_bounds = array<i64: 8, 128>}, {transform_indices = @transform_1, window_bounds = array<i64: 9, 8, 128>}]} {
    %c0 = arith.constant 0 : index
    %c0_0 = arith.constant 0 : index
    %0 = vector.load %arg1[%c0, %c0_0] : memref<8x128xf32, #tpu.memory_space<vmem>>, vector<8x128xf32>
    %c0_1 = arith.constant 0 : index
    %c0_2 = arith.constant 0 : index
    %c0_3 = arith.constant 0 : index
    %1 = vector.load %arg2[%c0_1, %c0_2, %c0_3] : memref<9x8x128xf32, #tpu.memory_space<vmem>>, vector<1x8x128xf32>
    %2 = vector.shape_cast %1 : vector<1x8x128xf32> to vector<8x128xf32>
    %3 = vector.shape_cast %0 : vector<8x128xf32> to vector<1x8x128xf32>
    tpu.vector_store %arg2[%c0_1, %c0_2, %c0_3], %3 {strides = array<i32>} : memref<9x8x128xf32, #tpu.memory_space<vmem>>, vector<1x8x128xf32>,
    %cst = arith.constant 3.14159274 : f32
    %4 = vector.broadcast %cst : f32 to vector<8x128xf32>
    %5 = arith.mulf %4, %0 : vector<8x128xf32>
    %6 = math.sin %5 : vector<8x128xf32>
    %7 = math.cos %5 : vector<8x128xf32>
    %c1 = arith.constant 1 : index
    %c0_4 = arith.constant 0 : index
    %c0_5 = arith.constant 0 : index
    %8 = vector.load %arg2[%c1, %c0_4, %c0_5] : memref<9x8x128xf32, #tpu.memory_space<vmem>>, vector<1x8x128xf32>
    %9 = vector.shape_cast %8 : vector<1x8x128xf32> to vector<8x128xf32>
    %10 = vector.shape_cast %6 : vector<8x128xf32> to vector<1x8x128xf32>
    tpu.vector_store %arg2[%c1, %c0_4, %c0_5], %10 {strides = array<i32>} : memref<9x8x128xf32, #tpu.memory_space<vmem>>, vector<1x8x128xf32>,
    %c2 = arith.constant 2 : index
    %c0_6 = arith.constant 0 : index
    %c0_7 = arith.constant 0 : index
    %11 = vector.load %arg2[%c2, %c0_6, %c0_7] : memref<9x8x128xf32, #tpu.memory_space<vmem>>, vector<1x8x128xf32>
    %12 = vector.shape_cast %11 : vector<1x8x128xf32> to vector<8x128xf32>
    %13 = vector.shape_cast %7 : vector<8x128xf32> to vector<1x8x128xf32>
    tpu.vector_store %arg2[%c2, %c0_6, %c0_7], %13 {strides = array<i32>} : memref<9x8x128xf32, #tpu.memory_space<vmem>>, vector<1x8x128xf32>,
    %cst_8 = arith.constant 2.000000e+00 : f32
    %14 = vector.broadcast %cst_8 : f32 to vector<8x128xf32>
    %15 = arith.mulf %14, %6 : vector<8x128xf32>
    %16 = arith.mulf %15, %7 : vector<8x128xf32>
    %17 = arith.mulf %7, %7 : vector<8x128xf32>
    %18 = arith.mulf %6, %6 : vector<8x128xf32>
    %19 = arith.subf %17, %18 : vector<8x128xf32>
    %c3 = arith.constant 3 : index
    %c0_9 = arith.constant 0 : index
    %c0_10 = arith.constant 0 : index
    %20 = vector.load %arg2[%c3, %c0_9, %c0_10] : memref<9x8x128xf32, #tpu.memory_space<vmem>>, vector<1x8x128xf32>
    %21 = vector.shape_cast %20 : vector<1x8x128xf32> to vector<8x128xf32>
    %22 = vector.shape_cast %16 : vector<8x128xf32> to vector<1x8x128xf32>
    tpu.vector_store %arg2[%c3, %c0_9, %c0_10], %22 {strides = array<i32>} : memref<9x8x128xf32, #tpu.memory_space<vmem>>, vector<1x8x128xf32>,
    %c4 = arith.constant 4 : index
    %c0_11 = arith.constant 0 : index
    %c0_12 = arith.constant 0 : index
    %23 = vector.load %arg2[%c4, %c0_11, %c0_12] : memref<9x8x128xf32, #tpu.memory_space<vmem>>, vector<1x8x128xf32>
    %24 = vector.shape_cast %23 : vector<1x8x128xf32> to vector<8x128xf32>
    %25 = vector.shape_cast %19 : vector<8x128xf32> to vector<1x8x128xf32>
    tpu.vector_store %arg2[%c4, %c0_11, %c0_12], %25 {strides = array<i32>} : memref<9x8x128xf32, #tpu.memory_space<vmem>>, vector<1x8x128xf32>,
    %cst_13 = arith.constant 2.000000e+00 : f32
    %26 = vector.broadcast %cst_13 : f32 to vector<8x128xf32>
    %27 = arith.mulf %26, %16 : vector<8x128xf32>
    %28 = arith.mulf %27, %19 : vector<8x128xf32>
    %29 = arith.mulf %19, %19 : vector<8x128xf32>
    %30 = arith.mulf %16, %16 : vector<8x128xf32>
    %31 = arith.subf %29, %30 : vector<8x128xf32>
    %c5 = arith.constant 5 : index
    %c0_14 = arith.constant 0 : index
    %c0_15 = arith.constant 0 : index
    %32 = vector.load %arg2[%c5, %c0_14, %c0_15] : memref<9x8x128xf32, #tpu.memory_space<vmem>>, vector<1x8x128xf32>
    %33 = vector.shape_cast %32 : vector<1x8x128xf32> to vector<8x128xf32>
    %34 = vector.shape_cast %28 : vector<8x128xf32> to vector<1x8x128xf32>
    tpu.vector_store %arg2[%c5, %c0_14, %c0_15], %34 {strides = array<i32>} : memref<9x8x128xf32, #tpu.memory_space<vmem>>, vector<1x8x128xf32>,
    %c6 = arith.constant 6 : index
    %c0_16 = arith.constant 0 : index
    %c0_17 = arith.constant 0 : index
    %35 = vector.load %arg2[%c6, %c0_16, %c0_17] : memref<9x8x128xf32, #tpu.memory_space<vmem>>, vector<1x8x128xf32>
    %36 = vector.shape_cast %35 : vector<1x8x128xf32> to vector<8x128xf32>
    %37 = vector.shape_cast %31 : vector<8x128xf32> to vector<1x8x128xf32>
    tpu.vector_store %arg2[%c6, %c0_16, %c0_17], %37 {strides = array<i32>} : memref<9x8x128xf32, #tpu.memory_space<vmem>>, vector<1x8x128xf32>,
    %cst_18 = arith.constant 2.000000e+00 : f32
    %38 = vector.broadcast %cst_18 : f32 to vector<8x128xf32>
    %39 = arith.mulf %38, %28 : vector<8x128xf32>
    %40 = arith.mulf %39, %31 : vector<8x128xf32>
    %41 = arith.mulf %31, %31 : vector<8x128xf32>
    %42 = arith.mulf %28, %28 : vector<8x128xf32>
    %43 = arith.subf %41, %42 : vector<8x128xf32>
    %c7 = arith.constant 7 : index
    %c0_19 = arith.constant 0 : index
    %c0_20 = arith.constant 0 : index
    %44 = vector.load %arg2[%c7, %c0_19, %c0_20] : memref<9x8x128xf32, #tpu.memory_space<vmem>>, vector<1x8x128xf32>
    %45 = vector.shape_cast %44 : vector<1x8x128xf32> to vector<8x128xf32>
    %46 = vector.shape_cast %40 : vector<8x128xf32> to vector<1x8x128xf32>
    tpu.vector_store %arg2[%c7, %c0_19, %c0_20], %46 {strides = array<i32>} : memref<9x8x128xf32, #tpu.memory_space<vmem>>, vector<1x8x128xf32>,
    %c8 = arith.constant 8 : index
    %c0_21 = arith.constant 0 : index
    %c0_22 = arith.constant 0 : index
    %47 = vector.load %arg2[%c8, %c0_21, %c0_22] : memref<9x8x128xf32, #tpu.memory_space<vmem>>, vector<1x8x128xf32>
    %48 = vector.shape_cast %47 : vector<1x8x128xf32> to vector<8x128xf32>
    %49 = vector.shape_cast %43 : vector<8x128xf32> to vector<1x8x128xf32>
    tpu.vector_store %arg2[%c8, %c0_21, %c0_22], %49 {strides = array<i32>} : memref<9x8x128xf32, #tpu.memory_space<vmem>>, vector<1x8x128xf32>,
    return
  }
  func.func @transform_0(%arg0: i32) -> (i32, i32) {
    %c0_i32 = arith.constant 0 : i32
    %c0_i32_0 = arith.constant 0 : i32
    return %arg0, %c0_i32 : i32, i32
  }
  func.func @transform_1(%arg0: i32) -> (i32, i32, i32) {
    %c0_i32 = arith.constant 0 : i32
    %c0_i32_0 = arith.constant 0 : i32
    %c0_i32_1 = arith.constant 0 : i32
    return %c0_i32, %arg0, %c0_i32_0 : i32, i32, i32
  }
}

</mosaic_0001>

<bundles_post_ra>
// kernel: tpu_custom_call.1
= control target key start
LH: loop header
LB: loop body
LE: loop exit
PB: predicated region body
PF: predicated region fallthrough
CT: control target
= control target key end

     0   :  { %6 = vsyncpa [#allocation3], 0  ;;  %s418_s0 = inlined_call_operand.hbm [shape: f32[8,128], index: 0, kind: input, shape index: {}]   ;;  %s419_s1 = inlined_call_operand.hbm [shape: f32[9,8,128], index: 1, kind: output, shape index: {}]  }
   0x1   :  { %7 = vsyncpa [#allocation4], 0  ;;  %s353_s6 = smov [#allocation2]   ;;  %s305_s10 = scalar_lea.hbm %s418_s0, 128 }
   0x2   :  { %s14_s7 = sshll.u32 %s353_s6, 4  ;;  %p306_p0 = scmp.ne.s32.totalorder %s418_s0, %s305_s10  ;;  %s15_s7 = int_to_ptr.vmem [resolvable:$true] %s14_s7 }
   0x3   :  { %p309_p1 = scmp.lt.u32.totalorder %s305_s10, %s418_s0 }
   0x5   :  { %p311_p2 = pnand %p309_p1, %p306_p0 }
   0x7   :  { %314 = shalt.err (!%p311_p2)
}
   0x8   :  { %s315_s15 = scalar_lea.vmem %s15_s7, 128  ;;  %p320_p4 = scmp.lt.s32.totalorder %s15_s7, %s15_s7 }
   0x9   :  { %p316_p3 = scmp.ne.s32.totalorder %s15_s7, %s315_s15  ;;  %p321_p5 = scmp.lt.s32.totalorder %s315_s15, %s315_s15 }
   0xb   :  { %p322_p6 = por %p321_p5, %p320_p4 }
   0xd   :  { %p323_p7 = pnand %p322_p6, %p316_p3 }
   0xf   :  { %326 = shalt.err (!%p323_p7)
}
  0x10   :  { %17 = dma.hbm_to_vmem [thread:$0]  %s418_s0, 128, %s15_s7, [#allocation3]  }
  0x11   :  { %349 = dma.done.wait [#allocation3], 128  }
  0x12   :  { %350 = vsyncadd [#allocation3], 4294967168  ;;  %v21_v0 = vld [vmem:[#allocation2] sm:$0xff]  ;;  %v354_v12 = vmov 2102212464   ;;  %s360_s0 = smov [#allocation5]  }
  0x13   :  { %22 = vst [vmem:[#allocation5] sm:$0xff] %v21_v0  ;;  %v385_v1 = vmul.f32 3.1415927, %v21_v0  ;;  %v355_v14 = vmov 920167782   ;;  %s267_s18 = sshll.u32 %s360_s0, 4  ;;  %s268_s18 = int_to_ptr.vmem [resolvable:$true] %s267_s18 }
  0x14   :  { %v356_v17 = vmov 683565275   ;;  %v357_v19 = vmov 2475754826   ;;  %v358_v21 = vmov 2131351028   ;;  %p332_p9 = scmp.lt.s32.totalorder %s268_s18, %s268_s18 }
  0x15   :  { %v27_v2 = vand.u32 2139095040, %v385_v1  ;;  %v24_v5 = vand.u32 2147483647, %v385_v1  ;;  %v359_v24 = vmov 1326507024   ;;  %vm26_vm7 = vcmp.lt.s32.totalorder %v385_v1, 0 }
  0x16   :  { %vm116_vm15 = vweird.f32 %v385_v1  ;;  %s327_s19 = scalar_lea.vmem %s268_s18, 1152 }
  0x17   :  { %v28_v3 = vshrl.u32 %v27_v2, 23  ;;  %v31_v8 = vand.u32 8388607, %v24_v5  ;;  %vm25_vm8 = vcmp.le.f32.partialorder %v24_v5, 0.7853982  ;;  %p328_p8 = scmp.ne.s32.totalorder %s268_s18, %s327_s19  ;;  %p333_p10 = scmp.lt.s32.totalorder %s327_s19, %s327_s19 }
  0x19   :  { %v279_v4 = vadd.s32 4294967169, %v28_v3  ;;  %v32_v16 = vor.u32 8388608, %v31_v8  ;;  %p334_p11 = por %p333_p10, %p332_p9 }
  0x1b   :  { %v34_v6 = vadd.s32 1, %v279_v4  ;;  %v72_v35 = vshll.u32 %v32_v16, 8  ;;  %p335_p12 = pnand %p334_p11, %p328_p8 }
  0x1d   :  { %vm35_vm0 = vcmp.gt.s32.totalorder %v34_v6, 0 }
  0x1e   :  { %v36_v7 = vsel %vm35_vm0, %v34_v6, 0 }
  0x1f   :  { %v38_v9 = vand.u32 31, %v36_v7  ;;  %v37_v10 = vshrl.u32 %v36_v7, 5 }
  0x21   :  { %v39_v11 = vsub.s32 32, %v38_v9  ;;  %v50_v13 = vshll.u32 %v354_v12, %v38_v9  ;;  %v53_v15 = vshll.u32 %v355_v14, %v38_v9  ;;  %v41_v18 = vshll.u32 %v356_v17, %v38_v9 }
  0x22   :  { %v44_v20 = vshll.u32 %v357_v19, %v38_v9  ;;  %v47_v22 = vshll.u32 %v358_v21, %v38_v9  ;;  %vm59_vm1 = vcmp.lt.s32.totalorder %v37_v10, 4  ;;  %vm56_vm2 = vcmp.lt.s32.totalorder %v37_v10, 1 }
  0x23   :  { %v51_v23 = vshrl.u32 %v355_v14, %v39_v11  ;;  %v54_v25 = vshrl.u32 %v359_v24, %v39_v11  ;;  %v40_v26 = vshrl.u32 %v356_v17, %v39_v11  ;;  %v42_v27 = vshrl.u32 %v357_v19, %v39_v11 }
  0x24   :  { %v45_v28 = vshrl.u32 %v358_v21, %v39_v11  ;;  %v48_v29 = vshrl.u32 %v354_v12, %v39_v11  ;;  %vm58_vm3 = vcmp.lt.s32.totalorder %v37_v10, 3  ;;  %vm57_vm4 = vcmp.lt.s32.totalorder %v37_v10, 2 }
  0x25   :  { %v52_v30 = vor.u32 %v51_v23, %v50_v13  ;;  %v55_v31 = vor.u32 %v54_v25, %v53_v15  ;;  %v43_v32 = vor.u32 %v42_v27, %v41_v18 }
  0x26   :  { %v46_v33 = vor.u32 %v45_v28, %v44_v20  ;;  %v49_v34 = vor.u32 %v48_v29, %v47_v22 }
  0x27   :  { %v65_v36 = vsel %vm59_vm1, %v52_v30, 920167782  ;;  %v69_v37 = vsel %vm59_vm1, %v55_v31, 1326507024  ;;  %v60_v38 = vsel %vm56_vm2, %v40_v26, %v43_v32 }
  0x28   :  { %v61_v39 = vsel %vm59_vm1, %v49_v34, 2102212464  ;;  %v64_v40 = vsel %vm56_vm2, %v43_v32, %v46_v33  ;;  %v66_v41 = vsel %vm58_vm3, %v49_v34, %v65_v36  ;;  %v68_v42 = vsel %vm56_vm2, %v46_v33, %v49_v34 }
  0x29   :  { %v62_v43 = vsel %vm58_vm3, %v46_v33, %v61_v39  ;;  %v67_v44 = vsel %vm57_vm4, %v64_v40, %v66_v41  ;;  %v70_v45 = vsel %vm58_vm3, %v52_v30, %v69_v37 }
  0x2a   :  { %v63_v46 = vsel %vm57_vm4, %v60_v38, %v62_v43  ;;  %v71_v47 = vsel %vm57_vm4, %v68_v42, %v70_v45  ;;  %v391_v48 = vmul.u32.u64.low %v72_v35, %v67_v44  ;;  %v392_v49 = vmul.u32.u64.high %v72_v35, %v67_v44, %v391_v48 }
  0x2b   :  { %v394_v50 = vmul.u32.u64.low %v72_v35, %v71_v47  ;;  %v395_v51 = vmul.u32.u64.high %v72_v35, %v71_v47, %v394_v50  ;;  %v79_v52 = vmul.u32 %v72_v35, %v63_v46 }
  0x2c   :  { %v82_v53 = vadd.s32 1, %v392_v49 }
  0x2d   :  { %vm81_vm5 = vc.u32 %v395_v51, %v391_v48  ;;  %v80_v0 = vadd.s32 %v391_v48, %v395_v51 }
  0x2e   :  { %v83_v54 = vsel %vm81_vm5, %v82_v53, %v392_v49 }
  0x2f   :  { %v84_v55 = vadd.s32 %v83_v54, %v79_v52 }
  0x31   :  { %v85_v56 = vadd.s32 536870912, %v84_v55 }
  0x33   :  { %v86_v57 = vshrl.u32 %v85_v56, 30 }
  0x35   :  { %v87_v58 = vshll.u32 %v86_v57, 30  ;;  %v110_v14 = vsub.s32 4, %v86_v57 }
  0x37   :  { %v88_v59 = vsub.s32 %v84_v55, %v87_v58  ;;  %v111_v17 = vsel %vm26_vm7, %v110_v14, %v86_v57 }
  0x38   :  { %v113_v20 = vsel %vm25_vm8, 0, %v111_v17 }
  0x39   :  { %v90_v60 = vsub.s32 0, %v88_v59  ;;  %v117_v21 = vadd.s32 3, %v113_v20  ;;  %v221_v23 = vand.u32 3, %v113_v20 }
  0x3b   :  { %v280_v61 = vmin.u32 %v90_v60, %v88_v59  ;;  %v118_v22 = vand.u32 3, %v117_v21  ;;  %vm226_vm10 = vcmp.eq.s32.totalorder %v221_v23, 2  ;;  %vm223_vm12 = vcmp.eq.s32.totalorder %v221_v23, 0 }
  0x3c   :  { %vm222_vm14 = vcmp.lt.s32.totalorder %v221_v23, 2 }
  0x3d   :  { %v92_v62 = vclz %v280_v61  ;;  %vm123_vm9 = vcmp.eq.s32.totalorder %v118_v22, 2  ;;  %vm120_vm11 = vcmp.eq.s32.totalorder %v118_v22, 0  ;;  %vm119_vm13 = vcmp.lt.s32.totalorder %v118_v22, 2 }
  0x3f   :  { %v281_v63 = vadd.s32 4294967294, %v92_v62 }
  0x41   :  { %vm282_vm6 = vcmp.lt.s32.totalorder %v281_v63, 0 }
  0x42   :  { %v95_v2 = vsel %vm282_vm6, 0, %v281_v63 }
  0x43   :  { %v96_v3 = vsub.s32 32, %v95_v2  ;;  %v97_v4 = vshll.u32 %v88_v59, %v95_v2  ;;  %v100_v6 = vsub.s32 4294967266, %v95_v2 }
  0x45   :  { %v98_v7 = vshrl.u32 %v80_v0, %v96_v3  ;;  %v101_v8 = vadd.s32 127, %v100_v6 }
  0x47   :  { %v99_v9 = vor.u32 %v98_v7, %v97_v4  ;;  %v102_v10 = vshll.u32 %v101_v8, 23 }
  0x49   :  { %v103_v11 = vor.u32 4788187, %v102_v10  ;;  %v106_v12 = vcvt.s32.f32 %v99_v9 }
  0x4b   :  { %v104_v13 = vand.u32 2147483647, %v103_v11 }
  0x4d   :  { %v107_v15 = vmul.f32 %v106_v12, %v104_v13 }
  0x4f   :  { %v108_v16 = vxor.u32 2147483648, %v107_v15 }
  0x51   :  { %v109_v18 = vsel %vm26_vm7, %v108_v16, %v107_v15 }
  0x52   :  { %v112_v19 = vsel %vm25_vm8, %v385_v1, %v109_v18 }
  0x53   :  { %301 = vcosq.f32 %v112_v19 }
  0x54   :  { %303 = vsinq.f32 %v112_v19 }
  0x5d   :  { %v302_v24 = vpop.eup %301 }
  0x5e   :  { %v304_v25 = vpop.eup %303  ;;  %v124_v26 = vxor.u32 2147483648, %v302_v24 }
  0x5f   :  { %v121_v5 = vxor.u32 2147483648, %v304_v25 }
  0x60   :  { %v125_v27 = vsel %vm123_vm9, %v124_v26, %v304_v25  ;;  %v228_v28 = vsel %vm226_vm10, %v124_v26, %v304_v25 }
  0x61   :  { %v122_v29 = vsel %vm120_vm11, %v302_v24, %v121_v5  ;;  %v225_v30 = vsel %vm223_vm12, %v302_v24, %v121_v5 }
  0x62   :  { %v126_v31 = vsel %vm119_vm13, %v122_v29, %v125_v27  ;;  %v229_v32 = vsel %vm222_vm14, %v225_v30, %v228_v28 }
  0x63   :  { %v127_v33 = vsel %vm116_vm15, nan, %v126_v31  ;;  %v230_v34 = vsel %vm116_vm15, nan, %v229_v32 }
  0x64   :  { %232 = vst [vmem:[#allocation5 + $0x8] sm:$0xff] %v127_v33  ;;  %v235_v35 = vmul.f32 2.0, %v127_v33  ;;  %v238_v36 = vmul.f32 %v127_v33, %v127_v33  ;;  %234 = vst [vmem:[#allocation5 + $0x10] sm:$0xff] %v230_v34  ;;  %v237_v37 = vmul.f32 %v230_v34, %v230_v34 }
  0x66   :  { %v236_v38 = vmul.f32 %v235_v35, %v230_v34  ;;  %v239_v39 = vsub.f32 %v237_v37, %v238_v36 }
  0x68   :  { %241 = vst [vmem:[#allocation5 + $0x18] sm:$0xff] %v236_v38  ;;  %243 = vst [vmem:[#allocation5 + $0x20] sm:$0xff] %v239_v39  ;;  %v244_v40 = vmul.f32 2.0, %v236_v38  ;;  %v246_v41 = vmul.f32 %v239_v39, %v239_v39  ;;  %v247_v1 = vmul.f32 %v236_v38, %v236_v38 }
  0x6a   :  { %v245_v42 = vmul.f32 %v244_v40, %v239_v39  ;;  %v248_v43 = vsub.f32 %v246_v41, %v247_v1 }
  0x6c   :  { %250 = vst [vmem:[#allocation5 + $0x28] sm:$0xff] %v245_v42  ;;  %252 = vst [vmem:[#allocation5 + $0x30] sm:$0xff] %v248_v43  ;;  %v253_v44 = vmul.f32 2.0, %v245_v42  ;;  %v255_v45 = vmul.f32 %v248_v43, %v248_v43  ;;  %v256_v46 = vmul.f32 %v245_v42, %v245_v42 }
  0x6e   :  { %v254_v47 = vmul.f32 %v253_v44, %v248_v43  ;;  %v257_v48 = vsub.f32 %v255_v45, %v256_v46 }
  0x70   :  { %259 = vst [vmem:[#allocation5 + $0x38] sm:$0xff] %v254_v47  ;;  %261 = vst [vmem:[#allocation5 + $0x40] sm:$0xff] %v257_v48 }
  0x71   :  { %338 = shalt.err (!%p335_p12)
}
  0x72   :  { %s339_s22 = scalar_lea.hbm %s419_s1, 1152 }
  0x73   :  { %p340_p13 = scmp.ne.s32.totalorder %s419_s1, %s339_s22  ;;  %p343_p0 = scmp.lt.u32.totalorder %s339_s22, %s419_s1 }
  0x75   :  { %p345_p1 = pnand %p343_p0, %p340_p13 }
  0x77   :  { %348 = shalt.err (!%p345_p1)
}
  0x78   :  { %s361_s27 = smov 128   ;;  %s362_s28 = smov 8  }
  0x79   :  { %273 = dma.vmem_to_hbm [thread:$0]  %s268_s18, 1152, %s419_s1, [#allocation4], %s361_s27, %s361_s27, %s362_s28  }
  0x7a   :  { %351 = dma.done.wait [#allocation4], 1152  }
  0x7b   :  { %352 = vsyncadd [#allocation4], 4294966144 }
  0x7c   :  { %277 = vsyncpa [#allocation3], 1 }
  0x7d   :  { %278 = vsyncpa [#allocation4], 1 }

</bundles_post_ra>
